<compile_context>
chip_gen: v7x
topology: tpu7x:2x2x1
jax: 0.10.0
libtpu: 0.0.40
codegen_flags: <defaults>
</compile_context>

<pallas_src>
import functools

import jax
import jax.numpy as jnp
from jax.experimental import pallas as pl
from jax.experimental.pallas import tpu as pltpu


def _round_up(a, b):
    return ((a + b - 1) // b) * b


# ---------------------------------------------------------------------------
# Pallas kernel: out = relu?(x @ w + b), K-accumulated in a f32 VMEM scratch.
# grid = (M tiles, N tiles, K tiles); K is the innermost ("arbitrary") axis.
# ---------------------------------------------------------------------------
def _matmul_bias_act_kernel(x_ref, w_ref, b_ref, o_ref, acc_ref, *, relu):
    k = pl.program_id(2)

    @pl.when(k == 0)
    def _():
        acc_ref[...] = jnp.zeros_like(acc_ref)

    acc_ref[...] += jnp.dot(
        x_ref[...].astype(jnp.bfloat16),
        w_ref[...].astype(jnp.bfloat16),
        preferred_element_type=jnp.float32,
    )

    @pl.when(k == pl.num_programs(2) - 1)
    def _():
        out = acc_ref[...] + b_ref[...]
        if relu:
            out = jnp.maximum(out, 0.0)
        o_ref[...] = out.astype(o_ref.dtype)


def linear_pallas(x, w, b, *, n_valid, relu, out_dtype):
    """act(x @ w + b)[:, :n_valid].

    x: (M, K)   activations (f32 or bf16)
    w: (K, Np)  bf16 weights, Np a multiple of 128 (lane-padded once at prepare time)
    b: (1, Np)  f32 bias row (padded to match)
    """
    M, K = x.shape
    K2, Np = w.shape
    assert K == K2, (K, K2)
    assert Np % 128 == 0, Np

    # --- tile selection: sized far below every generation's scoped-VMEM default ---
    # M tile: 256 when M is large (ragged edge handled by Pallas masked stores),
    # else one full-M block (full-dim blocks are always layout-legal).
    tm = 256 if M >= 256 else M
    # N tile: 256-aligned keeps the v6e/v7x 256x256 MXU full; 128 works everywhere.
    tn = 256 if Np % 256 == 0 else 128
    # K tile must divide K exactly (padding K would corrupt the accumulation);
    # all K values in this head are multiples of 128, else fall back to a single K block.
    tk = K
    for cand in (512, 256, 128):
        if K % cand == 0:
            tk = cand
            break

    grid = (pl.cdiv(M, tm), Np // tn, K // tk)
    kernel = functools.partial(_matmul_bias_act_kernel, relu=relu)

    out = pl.pallas_call(
        kernel,
        out_shape=jax.ShapeDtypeStruct((M, Np), out_dtype),
        grid_spec=pltpu.PrefetchScalarGridSpec(
            num_scalar_prefetch=0,
            grid=grid,
            in_specs=[
                pl.BlockSpec((tm, tk), lambda i, j, k: (i, k)),   # activations
                pl.BlockSpec((tk, tn), lambda i, j, k: (k, j)),   # weights (bf16)
                pl.BlockSpec((1, tn), lambda i, j, k: (0, j)),    # bias row (f32)
            ],
            out_specs=pl.BlockSpec((tm, tn), lambda i, j, k: (i, j)),
            scratch_shapes=[pltpu.VMEM((tm, tn), jnp.float32)],
        ),
        compiler_params=pltpu.CompilerParams(
            dimension_semantics=("parallel", "parallel", "arbitrary"),
            vmem_limit_bytes=32 * 1024 * 1024,
        ),
    )(x, w, b)

    if n_valid != Np:
        out = out[:, :n_valid]
    return out


# ---------------------------------------------------------------------------
# One-time weight preparation (would be done at model-load time in deployment):
#   - transpose to (K, N) matmul layout
#   - re-permute w_reduce_s / w_fc1 for channels-last (NHWC) activation flattening
#   - pad N up to a multiple of 128 (lane-dense stores)
#   - cast weights to bf16, keep biases f32
# ---------------------------------------------------------------------------
def prepare_params(params, cfg):
    conv_dim = cfg["conv_dim"]
    H, W = cfg["input_h"], cfg["input_w"]
    Ho, Wo = H // 2, W // 2
    prep = {}

    def pack(w_kn, b_n):
        K, N = w_kn.shape
        Np = _round_up(N, 128)
        if Np != N:
            w_kn = jnp.pad(w_kn, ((0, 0), (0, Np - N)))
            b_n = jnp.pad(b_n, ((0, Np - N),))
        return dict(w=w_kn.astype(jnp.bfloat16),
                    b=b_n.reshape(1, Np).astype(jnp.float32))

    if "w_reduce_c" in params:
        C = params["w_reduce_c"].shape[1]
        w = params["w_reduce_c"].reshape(conv_dim, C).T                    # (C, conv_dim)
        prep["reduce_c"] = pack(w, params["b_reduce_c"])

    # 2x2/stride-2 conv, NHWC patch order (kh, kw, cin): OIHW -> (kh, kw, I, O) -> (4I, O)
    w = jnp.transpose(params["w_reduce_s"], (2, 3, 1, 0)).reshape(4 * conv_dim, conv_dim)
    prep["reduce_s"] = pack(w, params["b_reduce_s"])

    # fc1: PyTorch flattens NCHW as (c, h, w); our activations flatten as (h, w, c).
    fc_dim = params["w_fc1"].shape[0]
    w = params["w_fc1"].reshape(fc_dim, conv_dim, Ho, Wo)
    w = jnp.transpose(w, (2, 3, 1, 0)).reshape(Ho * Wo * conv_dim, fc_dim)
    prep["fc1"] = pack(w, params["b_fc1"])

    prep["fc2"] = pack(params["w_fc2"].T, params["b_fc2"])
    prep["pred"] = pack(params["w_pred"].T, params["b_pred"])
    return prep


# ---------------------------------------------------------------------------
# CoarseMaskHead forward (Pallas), channels-last internally.
# ---------------------------------------------------------------------------
def coarse_mask_head_forward(x, prep, cfg):
    N = x.shape[0]
    C, H, W = cfg["input_channels"], cfg["input_h"], cfg["input_w"]
    conv_dim = cfg["conv_dim"]
    fc_dim = cfg["fc_dim"]
    R = cfg["output_side_resolution"]
    out_dim = cfg["num_classes"] * R * R
    Ho, Wo = H // 2, W // 2

    # x.view(N, C, H, W) -> channels-last once at entry
    x = x.reshape(N, C, H, W).astype(jnp.float32)
    xm = jnp.transpose(x, (0, 2, 3, 1)).reshape(N * H * W, C)

    # --- reduce_channel_dim_conv: 1x1 conv + bias + ReLU (only if C > conv_dim)
    if "reduce_c" in prep:
        p = prep["reduce_c"]
        xm = linear_pallas(xm, p["w"], p["b"], n_valid=conv_dim, relu=True,
                           out_dtype=jnp.bfloat16)
        Cc = conv_dim
    else:
        Cc = C

    # --- reduce_spatial_dim_conv: 2x2 conv, stride 2 + bias + ReLU (im2col in NHWC)
    xp = xm.reshape(N, Ho, 2, Wo, 2, Cc)
    xp = jnp.transpose(xp, (0, 1, 3, 2, 4, 5)).reshape(N * Ho * Wo, 4 * Cc)
    p = prep["reduce_s"]
    xm = linear_pallas(xp, p["w"], p["b"], n_valid=conv_dim, relu=True,
                       out_dtype=jnp.bfloat16)

    # --- flatten (channels-last order; fc1 weight pre-permuted to match)
    xm = xm.reshape(N, Ho * Wo * conv_dim)

    # --- FC layers + ReLU
    p = prep["fc1"]
    xm = linear_pallas(xm, p["w"], p["b"], n_valid=fc_dim, relu=True,
                       out_dtype=jnp.bfloat16)
    p = prep["fc2"]
    xm = linear_pallas(xm, p["w"], p["b"], n_valid=fc_dim, relu=True,
                       out_dtype=jnp.bfloat16)

    # --- prediction (no activation), f32 output
    p = prep["pred"]
    xm = linear_pallas(xm, p["w"], p["b"], n_valid=out_dim, relu=False,
                       out_dtype=jnp.float32)

    return xm.reshape(N, cfg["num_classes"], R, R)


# ---------------------------------------------------------------------------
# Pure-JAX reference in matching precision (bf16 operands, f32 accumulation,
# bf16 intermediate activations) but in the original PyTorch NCHW layout.
# ---------------------------------------------------------------------------
def reference_forward(x, params, cfg):
    N = x.shape[0]
    C, H, W = cfg["input_channels"], cfg["input_h"], cfg["input_w"]
    R = cfg["output_side_resolution"]
    x = x.reshape(N, C, H, W).astype(jnp.float32)
    dn = ("NCHW", "OIHW", "NCHW")

    def conv(x, w, b, stride):
        y = jax.lax.conv_general_dilated(
            x.astype(jnp.bfloat16), w.astype(jnp.bfloat16), stride, "VALID",
            dimension_numbers=dn, preferred_element_type=jnp.float32)
        y = jax.nn.relu(y + b[None, :, None, None])
        return y.astype(jnp.bfloat16)

    if "w_reduce_c" in params:
        x = conv(x, params["w_reduce_c"], params["b_reduce_c"], (1, 1))
    else:
        x = x.astype(jnp.bfloat16)
    x = conv(x, params["w_reduce_s"], params["b_reduce_s"], (2, 2))
    x = x.reshape(N, -1)   # NCHW (c, h, w) flatten, as in torch.flatten

    def fc(x, w, b, relu):
        y = jnp.dot(x.astype(jnp.bfloat16), w.T.astype(jnp.bfloat16),
                    preferred_element_type=jnp.float32) + b
        if relu:
            y = jax.nn.relu(y).astype(jnp.bfloat16)
        return y

    x = fc(x, params["w_fc1"], params["b_fc1"], True)
    x = fc(x, params["w_fc2"], params["b_fc2"], True)
    x = fc(x, params["w_pred"], params["b_pred"], False).astype(jnp.float32)
    return x.reshape(N, cfg["num_classes"], R, R)


# ---------------------------------------------------------------------------
# Deterministic synthetic parameter init (shapes follow the module's __init__).
# ---------------------------------------------------------------------------
def init_params(key, cfg):
    C = cfg["input_channels"]
    H, W = cfg["input_h"], cfg["input_w"]
    conv_dim = cfg["conv_dim"]
    fc_dim = cfg["fc_dim"]
    R = cfg["output_side_resolution"]
    out_dim = cfg["num_classes"] * R * R
    input_dim = conv_dim * H * W // 4

    keys = jax.random.split(key, 8)
    params = {}
    if C > conv_dim:
        params["w_reduce_c"] = jax.random.normal(keys[0], (conv_dim, C, 1, 1),
                                                 jnp.float32) * (2.0 / C) ** 0.5
        params["b_reduce_c"] = jnp.zeros((conv_dim,), jnp.float32)
    params["w_reduce_s"] = jax.random.normal(keys[1], (conv_dim, conv_dim, 2, 2),
                                             jnp.float32) * (2.0 / (conv_dim * 4)) ** 0.5
    params["b_reduce_s"] = jnp.zeros((conv_dim,), jnp.float32)
    params["w_fc1"] = jax.random.normal(keys[2], (fc_dim, input_dim),
                                        jnp.float32) * (1.0 / input_dim) ** 0.5
    params["b_fc1"] = jnp.zeros((fc_dim,), jnp.float32)
    params["w_fc2"] = jax.random.normal(keys[3], (fc_dim, fc_dim),
                                        jnp.float32) * (1.0 / fc_dim) ** 0.5
    params["b_fc2"] = jnp.zeros((fc_dim,), jnp.float32)
    params["w_pred"] = jax.random.normal(keys[4], (out_dim, fc_dim),
                                         jnp.float32) * 0.001
    params["b_pred"] = jnp.zeros((out_dim,), jnp.float32)
    return params


if __name__ == "__main__":
    # NOTE: the original module hardcodes conv_dim=256, fc_dim=1024; parametrized
    # here and run at small sizes for the synthetic test.
    cfg = dict(
        num_classes=4,
        input_channels=128,   # > conv_dim -> exercises reduce_channel_dim_conv
        input_h=8,
        input_w=8,
        conv_dim=64,
        fc_dim=128,
        output_side_resolution=7,
    )
    batch = 2

    key = jax.random.PRNGKey(0)
    k_x, k_p = jax.random.split(key)
    x = jax.random.normal(
        k_x, (batch, cfg["input_channels"], cfg["input_h"], cfg["input_w"]),
        jnp.float32)
    params = init_params(k_p, cfg)
    prep = prepare_params(params, cfg)   # one-time weight transforms

    fwd = jax.jit(functools.partial(coarse_mask_head_forward, cfg=cfg))
    out = jax.block_until_ready(fwd(x, prep))
    ref = jax.block_until_ready(reference_forward(x, params, cfg))

    assert out.shape == (batch, cfg["num_classes"], 7, 7), out.shape
    assert out.dtype == jnp.float32
    max_err = float(jnp.max(jnp.abs(out - ref)))
    assert jnp.allclose(out, ref, rtol=1e-2, atol=1e-3), max_err

    print("KERNEL_OK")
</pallas_src>

<mosaic_0001>
module attributes {stable_mosaic.version = 11 : i64} {
  func.func @_matmul_bias_act_kernel(%arg0: i32, %arg1: i32, %arg2: i32, %arg3: memref<32x256xbf16, #tpu.memory_space<vmem>>, %arg4: memref<256x128xbf16, #tpu.memory_space<vmem>>, %arg5: memref<1x128xf32, #tpu.memory_space<vmem>>, %arg6: memref<32x128xbf16, #tpu.memory_space<vmem>>, %arg7: memref<32x128xf32, #tpu.memory_space<vmem>>) attributes {dimension_semantics = [#tpu.dimension_semantics<parallel>, #tpu.dimension_semantics<parallel>, #tpu.dimension_semantics<arbitrary>], iteration_bounds = array<i64: 1, 1, 1>, scalar_prefetch = 0 : i64, scratch_operands = 1 : i64, tpu.core_type = #tpu.core_type<tc>, window_params = [{transform_indices = @transform_0, window_bounds = array<i64: 32, 256>}, {transform_indices = @transform_1, window_bounds = array<i64: 256, 128>}, {transform_indices = @transform_2, window_bounds = array<i64: 1, 128>}, {transform_indices = @transform_3, window_bounds = array<i64: 32, 128>}]} {
    %c0_i32 = arith.constant 0 : i32
    %0 = arith.cmpi eq, %arg2, %c0_i32 : i32
    %1 = arith.extui %0 : i1 to i32
    %c0_i32_0 = arith.constant 0 : i32
    %2 = arith.cmpi ne, %1, %c0_i32_0 : i32
    scf.if %2 {
      %cst_10 = arith.constant 0.000000e+00 : f32
      %12 = vector.broadcast %cst_10 : f32 to vector<32x128xf32>
      %c0_11 = arith.constant 0 : index
      %c0_12 = arith.constant 0 : index
      %13 = vector.load %arg7[%c0_11, %c0_12] : memref<32x128xf32, #tpu.memory_space<vmem>>, vector<32x128xf32>
      tpu.vector_store %arg7[%c0_11, %c0_12], %12 {strides = array<i32>} : memref<32x128xf32, #tpu.memory_space<vmem>>, vector<32x128xf32>,
    } else {
    }
    %c0 = arith.constant 0 : index
    %c0_1 = arith.constant 0 : index
    %3 = vector.load %arg7[%c0, %c0_1] : memref<32x128xf32, #tpu.memory_space<vmem>>, vector<32x128xf32>
    %c0_2 = arith.constant 0 : index
    %c0_3 = arith.constant 0 : index
    %4 = vector.load %arg3[%c0_2, %c0_3] : memref<32x256xbf16, #tpu.memory_space<vmem>>, vector<32x256xbf16>
    %c0_4 = arith.constant 0 : index
    %c0_5 = arith.constant 0 : index
    %5 = vector.load %arg4[%c0_4, %c0_5] : memref<256x128xbf16, #tpu.memory_space<vmem>>, vector<256x128xbf16>
    %cst = arith.constant dense<0.000000e+00> : vector<32x128xf32>
    %6 = tpu.matmul %4, %5, %cst {dimension_numbers = #tpu.dot_dimension_numbers<[1], [0], [0], [1], [0, 0, 1, 1], [], []>} : vector<32x256xbf16>, vector<256x128xbf16>, vector<32x128xf32> -> vector<32x128xf32>
    %7 = arith.addf %3, %6 : vector<32x128xf32>
    %c0_6 = arith.constant 0 : index
    %c0_7 = arith.constant 0 : index
    %8 = vector.load %arg7[%c0_6, %c0_7] : memref<32x128xf32, #tpu.memory_space<vmem>>, vector<32x128xf32>
    tpu.vector_store %arg7[%c0_6, %c0_7], %7 {strides = array<i32>} : memref<32x128xf32, #tpu.memory_space<vmem>>, vector<32x128xf32>,
    %c0_i32_8 = arith.constant 0 : i32
    %9 = arith.cmpi eq, %arg2, %c0_i32_8 : i32
    %10 = arith.extui %9 : i1 to i32
    %c0_i32_9 = arith.constant 0 : i32
    %11 = arith.cmpi ne, %10, %c0_i32_9 : i32
    scf.if %11 {
      %c0_10 = arith.constant 0 : index
      %c0_11 = arith.constant 0 : index
      %12 = vector.load %arg7[%c0_10, %c0_11] : memref<32x128xf32, #tpu.memory_space<vmem>>, vector<32x128xf32>
      %c0_12 = arith.constant 0 : index
      %c0_13 = arith.constant 0 : index
      %13 = vector.load %arg5[%c0_12, %c0_13] : memref<1x128xf32, #tpu.memory_space<vmem>>, vector<1x128xf32>
      %14 = vector.broadcast %13 : vector<1x128xf32> to vector<32x128xf32>
      %15 = arith.addf %12, %14 : vector<32x128xf32>
      %cst_14 = arith.constant 0.000000e+00 : f32
      %16 = vector.broadcast %cst_14 : f32 to vector<32x128xf32>
      %17 = arith.maximumf %15, %16 : vector<32x128xf32>
      %18 = arith.truncf %17 : vector<32x128xf32> to vector<32x128xbf16>
      %c0_15 = arith.constant 0 : index
      %c0_16 = arith.constant 0 : index
      %19 = vector.load %arg6[%c0_15, %c0_16] : memref<32x128xbf16, #tpu.memory_space<vmem>>, vector<32x128xbf16>
      tpu.vector_store %arg6[%c0_15, %c0_16], %18 {strides = array<i32>} : memref<32x128xbf16, #tpu.memory_space<vmem>>, vector<32x128xbf16>,
    } else {
    }
    return
  }
  func.func @transform_0(%arg0: i32, %arg1: i32, %arg2: i32) -> (i32, i32) {
    %c0_i32 = arith.constant 0 : i32
    return %arg0, %arg2 : i32, i32
  }
  func.func @transform_1(%arg0: i32, %arg1: i32, %arg2: i32) -> (i32, i32) {
    %c0_i32 = arith.constant 0 : i32
    return %arg2, %arg1 : i32, i32
  }
  func.func @transform_2(%arg0: i32, %arg1: i32, %arg2: i32) -> (i32, i32) {
    %c0_i32 = arith.constant 0 : i32
    %c0_i32_0 = arith.constant 0 : i32
    return %c0_i32, %arg1 : i32, i32
  }
  func.func @transform_3(%arg0: i32, %arg1: i32, %arg2: i32) -> (i32, i32) {
    %c0_i32 = arith.constant 0 : i32
    return %arg0, %arg1 : i32, i32
  }
}

module attributes {stable_mosaic.version = 11 : i64} {
  func.func @_matmul_bias_act_kernel(%arg0: i32, %arg1: i32, %arg2: i32, %arg3: memref<128x128xf32, #tpu.memory_space<vmem>>, %arg4: memref<128x128xbf16, #tpu.memory_space<vmem>>, %arg5: memref<1x128xf32, #tpu.memory_space<vmem>>, %arg6: memref<128x128xbf16, #tpu.memory_space<vmem>>, %arg7: memref<128x128xf32, #tpu.memory_space<vmem>>) attributes {dimension_semantics = [#tpu.dimension_semantics<parallel>, #tpu.dimension_semantics<parallel>, #tpu.dimension_semantics<arbitrary>], iteration_bounds = array<i64: 1, 1, 1>, scalar_prefetch = 0 : i64, scratch_operands = 1 : i64, tpu.core_type = #tpu.core_type<tc>, window_params = [{transform_indices = @transform_0, window_bounds = array<i64: 128, 128>}, {transform_indices = @transform_1, window_bounds = array<i64: 128, 128>}, {transform_indices = @transform_2, window_bounds = array<i64: 1, 128>}, {transform_indices = @transform_3, window_bounds = array<i64: 128, 128>}]} {
    %c0_i32 = arith.constant 0 : i32
    %0 = arith.cmpi eq, %arg2, %c0_i32 : i32
    %1 = arith.extui %0 : i1 to i32
    %c0_i32_0 = arith.constant 0 : i32
    %2 = arith.cmpi ne, %1, %c0_i32_0 : i32
    scf.if %2 {
      %cst_10 = arith.constant 0.000000e+00 : f32
      %13 = vector.broadcast %cst_10 : f32 to vector<128x128xf32>
      %c0_11 = arith.constant 0 : index
      %c0_12 = arith.constant 0 : index
      %14 = vector.load %arg7[%c0_11, %c0_12] : memref<128x128xf32, #tpu.memory_space<vmem>>, vector<128x128xf32>
      tpu.vector_store %arg7[%c0_11, %c0_12], %13 {strides = array<i32>} : memref<128x128xf32, #tpu.memory_space<vmem>>, vector<128x128xf32>,
    } else {
    }
    %c0 = arith.constant 0 : index
    %c0_1 = arith.constant 0 : index
    %3 = vector.load %arg7[%c0, %c0_1] : memref<128x128xf32, #tpu.memory_space<vmem>>, vector<128x128xf32>
    %c0_2 = arith.constant 0 : index
    %c0_3 = arith.constant 0 : index
    %4 = vector.load %arg3[%c0_2, %c0_3] : memref<128x128xf32, #tpu.memory_space<vmem>>, vector<128x128xf32>
    %5 = arith.truncf %4 : vector<128x128xf32> to vector<128x128xbf16>
    %c0_4 = arith.constant 0 : index
    %c0_5 = arith.constant 0 : index
    %6 = vector.load %arg4[%c0_4, %c0_5] : memref<128x128xbf16, #tpu.memory_space<vmem>>, vector<128x128xbf16>
    %cst = arith.constant dense<0.000000e+00> : vector<128x128xf32>
    %7 = tpu.matmul %5, %6, %cst {dimension_numbers = #tpu.dot_dimension_numbers<[1], [0], [0], [1], [0, 0, 1, 1], [], []>} : vector<128x128xbf16>, vector<128x128xbf16>, vector<128x128xf32> -> vector<128x128xf32>
    %8 = arith.addf %3, %7 : vector<128x128xf32>
    %c0_6 = arith.constant 0 : index
    %c0_7 = arith.constant 0 : index
    %9 = vector.load %arg7[%c0_6, %c0_7] : memref<128x128xf32, #tpu.memory_space<vmem>>, vector<128x128xf32>
    tpu.vector_store %arg7[%c0_6, %c0_7], %8 {strides = array<i32>} : memref<128x128xf32, #tpu.memory_space<vmem>>, vector<128x128xf32>,
    %c0_i32_8 = arith.constant 0 : i32
    %10 = arith.cmpi eq, %arg2, %c0_i32_8 : i32
    %11 = arith.extui %10 : i1 to i32
    %c0_i32_9 = arith.constant 0 : i32
    %12 = arith.cmpi ne, %11, %c0_i32_9 : i32
    scf.if %12 {
      %c0_10 = arith.constant 0 : index
      %c0_11 = arith.constant 0 : index
      %13 = vector.load %arg7[%c0_10, %c0_11] : memref<128x128xf32, #tpu.memory_space<vmem>>, vector<128x128xf32>
      %c0_12 = arith.constant 0 : index
      %c0_13 = arith.constant 0 : index
      %14 = vector.load %arg5[%c0_12, %c0_13] : memref<1x128xf32, #tpu.memory_space<vmem>>, vector<1x128xf32>
      %15 = vector.broadcast %14 : vector<1x128xf32> to vector<128x128xf32>
      %16 = arith.addf %13, %15 : vector<128x128xf32>
      %cst_14 = arith.constant 0.000000e+00 : f32
      %17 = vector.broadcast %cst_14 : f32 to vector<128x128xf32>
      %18 = arith.maximumf %16, %17 : vector<128x128xf32>
      %19 = arith.truncf %18 : vector<128x128xf32> to vector<128x128xbf16>
      %c0_15 = arith.constant 0 : index
      %c0_16 = arith.constant 0 : index
      %20 = vector.load %arg6[%c0_15, %c0_16] : memref<128x128xbf16, #tpu.memory_space<vmem>>, vector<128x128xbf16>
      tpu.vector_store %arg6[%c0_15, %c0_16], %19 {strides = array<i32>} : memref<128x128xbf16, #tpu.memory_space<vmem>>, vector<128x128xbf16>,
    } else {
    }
    return
  }
  func.func @transform_0(%arg0: i32, %arg1: i32, %arg2: i32) -> (i32, i32) {
    %c0_i32 = arith.constant 0 : i32
    return %arg0, %arg2 : i32, i32
  }
  func.func @transform_1(%arg0: i32, %arg1: i32, %arg2: i32) -> (i32, i32) {
    %c0_i32 = arith.constant 0 : i32
    return %arg2, %arg1 : i32, i32
  }
  func.func @transform_2(%arg0: i32, %arg1: i32, %arg2: i32) -> (i32, i32) {
    %c0_i32 = arith.constant 0 : i32
    %c0_i32_0 = arith.constant 0 : i32
    return %c0_i32, %arg1 : i32, i32
  }
  func.func @transform_3(%arg0: i32, %arg1: i32, %arg2: i32) -> (i32, i32) {
    %c0_i32 = arith.constant 0 : i32
    return %arg0, %arg1 : i32, i32
  }
}

module attributes {stable_mosaic.version = 11 : i64} {
  func.func @_matmul_bias_act_kernel(%arg0: i32, %arg1: i32, %arg2: i32, %arg3: memref<2x512xbf16, #tpu.memory_space<vmem>>, %arg4: memref<512x128xbf16, #tpu.memory_space<vmem>>, %arg5: memref<1x128xf32, #tpu.memory_space<vmem>>, %arg6: memref<2x128xbf16, #tpu.memory_space<vmem>>, %arg7: memref<2x128xf32, #tpu.memory_space<vmem>>) attributes {dimension_semantics = [#tpu.dimension_semantics<parallel>, #tpu.dimension_semantics<parallel>, #tpu.dimension_semantics<arbitrary>], iteration_bounds = array<i64: 1, 1, 2>, scalar_prefetch = 0 : i64, scratch_operands = 1 : i64, tpu.core_type = #tpu.core_type<tc>, window_params = [{transform_indices = @transform_0, window_bounds = array<i64: 2, 512>}, {transform_indices = @transform_1, window_bounds = array<i64: 512, 128>}, {transform_indices = @transform_2, window_bounds = array<i64: 1, 128>}, {transform_indices = @transform_3, window_bounds = array<i64: 2, 128>}]} {
    %c0_i32 = arith.constant 0 : i32
    %0 = arith.cmpi eq, %arg2, %c0_i32 : i32
    %1 = arith.extui %0 : i1 to i32
    %c0_i32_0 = arith.constant 0 : i32
    %2 = arith.cmpi ne, %1, %c0_i32_0 : i32
    scf.if %2 {
      %cst_9 = arith.constant 0.000000e+00 : f32
      %12 = vector.broadcast %cst_9 : f32 to vector<2x128xf32>
      %c0_10 = arith.constant 0 : index
      %c0_11 = arith.constant 0 : index
      %13 = vector.load %arg7[%c0_10, %c0_11] : memref<2x128xf32, #tpu.memory_space<vmem>>, vector<2x128xf32>
      tpu.vector_store %arg7[%c0_10, %c0_11], %12 {strides = array<i32>} : memref<2x128xf32, #tpu.memory_space<vmem>>, vector<2x128xf32>,
    } else {
    }
    %c0 = arith.constant 0 : index
    %c0_1 = arith.constant 0 : index
    %3 = vector.load %arg7[%c0, %c0_1] : memref<2x128xf32, #tpu.memory_space<vmem>>, vector<2x128xf32>
    %c0_2 = arith.constant 0 : index
    %c0_3 = arith.constant 0 : index
    %4 = vector.load %arg3[%c0_2, %c0_3] : memref<2x512xbf16, #tpu.memory_space<vmem>>, vector<2x512xbf16>
    %c0_4 = arith.constant 0 : index
    %c0_5 = arith.constant 0 : index
    %5 = vector.load %arg4[%c0_4, %c0_5] : memref<512x128xbf16, #tpu.memory_space<vmem>>, vector<512x128xbf16>
    %cst = arith.constant dense<0.000000e+00> : vector<2x128xf32>
    %6 = tpu.matmul %4, %5, %cst {dimension_numbers = #tpu.dot_dimension_numbers<[1], [0], [0], [1], [0, 0, 1, 1], [], []>} : vector<2x512xbf16>, vector<512x128xbf16>, vector<2x128xf32> -> vector<2x128xf32>
    %7 = arith.addf %3, %6 : vector<2x128xf32>
    %c0_6 = arith.constant 0 : index
    %c0_7 = arith.constant 0 : index
    %8 = vector.load %arg7[%c0_6, %c0_7] : memref<2x128xf32, #tpu.memory_space<vmem>>, vector<2x128xf32>
    tpu.vector_store %arg7[%c0_6, %c0_7], %7 {strides = array<i32>} : memref<2x128xf32, #tpu.memory_space<vmem>>, vector<2x128xf32>,
    %c1_i32 = arith.constant 1 : i32
    %9 = arith.cmpi eq, %arg2, %c1_i32 : i32
    %10 = arith.extui %9 : i1 to i32
    %c0_i32_8 = arith.constant 0 : i32
    %11 = arith.cmpi ne, %10, %c0_i32_8 : i32
    scf.if %11 {
      %c0_9 = arith.constant 0 : index
      %c0_10 = arith.constant 0 : index
      %12 = vector.load %arg7[%c0_9, %c0_10] : memref<2x128xf32, #tpu.memory_space<vmem>>, vector<2x128xf32>
      %c0_11 = arith.constant 0 : index
      %c0_12 = arith.constant 0 : index
      %13 = vector.load %arg5[%c0_11, %c0_12] : memref<1x128xf32, #tpu.memory_space<vmem>>, vector<1x128xf32>
      %14 = vector.broadcast %13 : vector<1x128xf32> to vector<2x128xf32>
      %15 = arith.addf %12, %14 : vector<2x128xf32>
      %cst_13 = arith.constant 0.000000e+00 : f32
      %16 = vector.broadcast %cst_13 : f32 to vector<2x128xf32>
      %17 = arith.maximumf %15, %16 : vector<2x128xf32>
      %18 = arith.truncf %17 : vector<2x128xf32> to vector<2x128xbf16>
      %c0_14 = arith.constant 0 : index
      %c0_15 = arith.constant 0 : index
      %19 = vector.load %arg6[%c0_14, %c0_15] : memref<2x128xbf16, #tpu.memory_space<vmem>>, vector<2x128xbf16>
      tpu.vector_store %arg6[%c0_14, %c0_15], %18 {strides = array<i32>} : memref<2x128xbf16, #tpu.memory_space<vmem>>, vector<2x128xbf16>,
    } else {
    }
    return
  }
  func.func @transform_0(%arg0: i32, %arg1: i32, %arg2: i32) -> (i32, i32) {
    %c0_i32 = arith.constant 0 : i32
    return %arg0, %arg2 : i32, i32
  }
  func.func @transform_1(%arg0: i32, %arg1: i32, %arg2: i32) -> (i32, i32) {
    %c0_i32 = arith.constant 0 : i32
    return %arg2, %arg1 : i32, i32
  }
  func.func @transform_2(%arg0: i32, %arg1: i32, %arg2: i32) -> (i32, i32) {
    %c0_i32 = arith.constant 0 : i32
    %c0_i32_0 = arith.constant 0 : i32
    return %c0_i32, %arg1 : i32, i32
  }
  func.func @transform_3(%arg0: i32, %arg1: i32, %arg2: i32) -> (i32, i32) {
    %c0_i32 = arith.constant 0 : i32
    return %arg0, %arg1 : i32, i32
  }
}

module attributes {stable_mosaic.version = 11 : i64} {
  func.func @_matmul_bias_act_kernel(%arg0: i32, %arg1: i32, %arg2: i32, %arg3: memref<2x128xbf16, #tpu.memory_space<vmem>>, %arg4: memref<128x128xbf16, #tpu.memory_space<vmem>>, %arg5: memref<1x128xf32, #tpu.memory_space<vmem>>, %arg6: memref<2x128xbf16, #tpu.memory_space<vmem>>, %arg7: memref<2x128xf32, #tpu.memory_space<vmem>>) attributes {dimension_semantics = [#tpu.dimension_semantics<parallel>, #tpu.dimension_semantics<parallel>, #tpu.dimension_semantics<arbitrary>], iteration_bounds = array<i64: 1, 1, 1>, scalar_prefetch = 0 : i64, scratch_operands = 1 : i64, tpu.core_type = #tpu.core_type<tc>, window_params = [{transform_indices = @transform_0, window_bounds = array<i64: 2, 128>}, {transform_indices = @transform_1, window_bounds = array<i64: 128, 128>}, {transform_indices = @transform_2, window_bounds = array<i64: 1, 128>}, {transform_indices = @transform_3, window_bounds = array<i64: 2, 128>}]} {
    %c0_i32 = arith.constant 0 : i32
    %0 = arith.cmpi eq, %arg2, %c0_i32 : i32
    %1 = arith.extui %0 : i1 to i32
    %c0_i32_0 = arith.constant 0 : i32
    %2 = arith.cmpi ne, %1, %c0_i32_0 : i32
    scf.if %2 {
      %cst_10 = arith.constant 0.000000e+00 : f32
      %12 = vector.broadcast %cst_10 : f32 to vector<2x128xf32>
      %c0_11 = arith.constant 0 : index
      %c0_12 = arith.constant 0 : index
      %13 = vector.load %arg7[%c0_11, %c0_12] : memref<2x128xf32, #tpu.memory_space<vmem>>, vector<2x128xf32>
      tpu.vector_store %arg7[%c0_11, %c0_12], %12 {strides = array<i32>} : memref<2x128xf32, #tpu.memory_space<vmem>>, vector<2x128xf32>,
    } else {
    }
    %c0 = arith.constant 0 : index
    %c0_1 = arith.constant 0 : index
    %3 = vector.load %arg7[%c0, %c0_1] : memref<2x128xf32, #tpu.memory_space<vmem>>, vector<2x128xf32>
    %c0_2 = arith.constant 0 : index
    %c0_3 = arith.constant 0 : index
    %4 = vector.load %arg3[%c0_2, %c0_3] : memref<2x128xbf16, #tpu.memory_space<vmem>>, vector<2x128xbf16>
    %c0_4 = arith.constant 0 : index
    %c0_5 = arith.constant 0 : index
    %5 = vector.load %arg4[%c0_4, %c0_5] : memref<128x128xbf16, #tpu.memory_space<vmem>>, vector<128x128xbf16>
    %cst = arith.constant dense<0.000000e+00> : vector<2x128xf32>
    %6 = tpu.matmul %4, %5, %cst {dimension_numbers = #tpu.dot_dimension_numbers<[1], [0], [0], [1], [0, 0, 1, 1], [], []>} : vector<2x128xbf16>, vector<128x128xbf16>, vector<2x128xf32> -> vector<2x128xf32>
    %7 = arith.addf %3, %6 : vector<2x128xf32>
    %c0_6 = arith.constant 0 : index
    %c0_7 = arith.constant 0 : index
    %8 = vector.load %arg7[%c0_6, %c0_7] : memref<2x128xf32, #tpu.memory_space<vmem>>, vector<2x128xf32>
    tpu.vector_store %arg7[%c0_6, %c0_7], %7 {strides = array<i32>} : memref<2x128xf32, #tpu.memory_space<vmem>>, vector<2x128xf32>,
    %c0_i32_8 = arith.constant 0 : i32
    %9 = arith.cmpi eq, %arg2, %c0_i32_8 : i32
    %10 = arith.extui %9 : i1 to i32
    %c0_i32_9 = arith.constant 0 : i32
    %11 = arith.cmpi ne, %10, %c0_i32_9 : i32
    scf.if %11 {
      %c0_10 = arith.constant 0 : index
      %c0_11 = arith.constant 0 : index
      %12 = vector.load %arg7[%c0_10, %c0_11] : memref<2x128xf32, #tpu.memory_space<vmem>>, vector<2x128xf32>
      %c0_12 = arith.constant 0 : index
      %c0_13 = arith.constant 0 : index
      %13 = vector.load %arg5[%c0_12, %c0_13] : memref<1x128xf32, #tpu.memory_space<vmem>>, vector<1x128xf32>
      %14 = vector.broadcast %13 : vector<1x128xf32> to vector<2x128xf32>
      %15 = arith.addf %12, %14 : vector<2x128xf32>
      %cst_14 = arith.constant 0.000000e+00 : f32
      %16 = vector.broadcast %cst_14 : f32 to vector<2x128xf32>
      %17 = arith.maximumf %15, %16 : vector<2x128xf32>
      %18 = arith.truncf %17 : vector<2x128xf32> to vector<2x128xbf16>
      %c0_15 = arith.constant 0 : index
      %c0_16 = arith.constant 0 : index
      %19 = vector.load %arg6[%c0_15, %c0_16] : memref<2x128xbf16, #tpu.memory_space<vmem>>, vector<2x128xbf16>
      tpu.vector_store %arg6[%c0_15, %c0_16], %18 {strides = array<i32>} : memref<2x128xbf16, #tpu.memory_space<vmem>>, vector<2x128xbf16>,
    } else {
    }
    return
  }
  func.func @transform_0(%arg0: i32, %arg1: i32, %arg2: i32) -> (i32, i32) {
    %c0_i32 = arith.constant 0 : i32
    return %arg0, %arg2 : i32, i32
  }
  func.func @transform_1(%arg0: i32, %arg1: i32, %arg2: i32) -> (i32, i32) {
    %c0_i32 = arith.constant 0 : i32
    return %arg2, %arg1 : i32, i32
  }
  func.func @transform_2(%arg0: i32, %arg1: i32, %arg2: i32) -> (i32, i32) {
    %c0_i32 = arith.constant 0 : i32
    %c0_i32_0 = arith.constant 0 : i32
    return %c0_i32, %arg1 : i32, i32
  }
  func.func @transform_3(%arg0: i32, %arg1: i32, %arg2: i32) -> (i32, i32) {
    %c0_i32 = arith.constant 0 : i32
    return %arg0, %arg1 : i32, i32
  }
}

module attributes {stable_mosaic.version = 11 : i64} {
  func.func @_matmul_bias_act_kernel(%arg0: i32, %arg1: i32, %arg2: i32, %arg3: memref<2x128xbf16, #tpu.memory_space<vmem>>, %arg4: memref<128x256xbf16, #tpu.memory_space<vmem>>, %arg5: memref<1x256xf32, #tpu.memory_space<vmem>>, %arg6: memref<2x256xf32, #tpu.memory_space<vmem>>, %arg7: memref<2x256xf32, #tpu.memory_space<vmem>>) attributes {dimension_semantics = [#tpu.dimension_semantics<parallel>, #tpu.dimension_semantics<parallel>, #tpu.dimension_semantics<arbitrary>], iteration_bounds = array<i64: 1, 1, 1>, scalar_prefetch = 0 : i64, scratch_operands = 1 : i64, tpu.core_type = #tpu.core_type<tc>, window_params = [{transform_indices = @transform_0, window_bounds = array<i64: 2, 128>}, {transform_indices = @transform_1, window_bounds = array<i64: 128, 256>}, {transform_indices = @transform_2, window_bounds = array<i64: 1, 256>}, {transform_indices = @transform_3, window_bounds = array<i64: 2, 256>}]} {
    %c0_i32 = arith.constant 0 : i32
    %0 = arith.cmpi eq, %arg2, %c0_i32 : i32
    %1 = arith.extui %0 : i1 to i32
    %c0_i32_0 = arith.constant 0 : i32
    %2 = arith.cmpi ne, %1, %c0_i32_0 : i32
    scf.if %2 {
      %cst_10 = arith.constant 0.000000e+00 : f32
      %12 = vector.broadcast %cst_10 : f32 to vector<2x256xf32>
      %c0_11 = arith.constant 0 : index
      %c0_12 = arith.constant 0 : index
      %13 = vector.load %arg7[%c0_11, %c0_12] : memref<2x256xf32, #tpu.memory_space<vmem>>, vector<2x256xf32>
      tpu.vector_store %arg7[%c0_11, %c0_12], %12 {strides = array<i32>} : memref<2x256xf32, #tpu.memory_space<vmem>>, vector<2x256xf32>,
    } else {
    }
    %c0 = arith.constant 0 : index
    %c0_1 = arith.constant 0 : index
    %3 = vector.load %arg7[%c0, %c0_1] : memref<2x256xf32, #tpu.memory_space<vmem>>, vector<2x256xf32>
    %c0_2 = arith.constant 0 : index
    %c0_3 = arith.constant 0 : index
    %4 = vector.load %arg3[%c0_2, %c0_3] : memref<2x128xbf16, #tpu.memory_space<vmem>>, vector<2x128xbf16>
    %c0_4 = arith.constant 0 : index
    %c0_5 = arith.constant 0 : index
    %5 = vector.load %arg4[%c0_4, %c0_5] : memref<128x256xbf16, #tpu.memory_space<vmem>>, vector<128x256xbf16>
    %cst = arith.constant dense<0.000000e+00> : vector<2x256xf32>
    %6 = tpu.matmul %4, %5, %cst {dimension_numbers = #tpu.dot_dimension_numbers<[1], [0], [0], [1], [0, 0, 1, 1], [], []>} : vector<2x128xbf16>, vector<128x256xbf16>, vector<2x256xf32> -> vector<2x256xf32>
    %7 = arith.addf %3, %6 : vector<2x256xf32>
    %c0_6 = arith.constant 0 : index
    %c0_7 = arith.constant 0 : index
    %8 = vector.load %arg7[%c0_6, %c0_7] : memref<2x256xf32, #tpu.memory_space<vmem>>, vector<2x256xf32>
    tpu.vector_store %arg7[%c0_6, %c0_7], %7 {strides = array<i32>} : memref<2x256xf32, #tpu.memory_space<vmem>>, vector<2x256xf32>,
    %c0_i32_8 = arith.constant 0 : i32
    %9 = arith.cmpi eq, %arg2, %c0_i32_8 : i32
    %10 = arith.extui %9 : i1 to i32
    %c0_i32_9 = arith.constant 0 : i32
    %11 = arith.cmpi ne, %10, %c0_i32_9 : i32
    scf.if %11 {
      %c0_10 = arith.constant 0 : index
      %c0_11 = arith.constant 0 : index
      %12 = vector.load %arg7[%c0_10, %c0_11] : memref<2x256xf32, #tpu.memory_space<vmem>>, vector<2x256xf32>
      %c0_12 = arith.constant 0 : index
      %c0_13 = arith.constant 0 : index
      %13 = vector.load %arg5[%c0_12, %c0_13] : memref<1x256xf32, #tpu.memory_space<vmem>>, vector<1x256xf32>
      %14 = vector.broadcast %13 : vector<1x256xf32> to vector<2x256xf32>
      %15 = arith.addf %12, %14 : vector<2x256xf32>
      %c0_14 = arith.constant 0 : index
      %c0_15 = arith.constant 0 : index
      %16 = vector.load %arg6[%c0_14, %c0_15] : memref<2x256xf32, #tpu.memory_space<vmem>>, vector<2x256xf32>
      tpu.vector_store %arg6[%c0_14, %c0_15], %15 {strides = array<i32>} : memref<2x256xf32, #tpu.memory_space<vmem>>, vector<2x256xf32>,
    } else {
    }
    return
  }
  func.func @transform_0(%arg0: i32, %arg1: i32, %arg2: i32) -> (i32, i32) {
    %c0_i32 = arith.constant 0 : i32
    return %arg0, %arg2 : i32, i32
  }
  func.func @transform_1(%arg0: i32, %arg1: i32, %arg2: i32) -> (i32, i32) {
    %c0_i32 = arith.constant 0 : i32
    return %arg2, %arg1 : i32, i32
  }
  func.func @transform_2(%arg0: i32, %arg1: i32, %arg2: i32) -> (i32, i32) {
    %c0_i32 = arith.constant 0 : i32
    %c0_i32_0 = arith.constant 0 : i32
    return %c0_i32, %arg1 : i32, i32
  }
  func.func @transform_3(%arg0: i32, %arg1: i32, %arg2: i32) -> (i32, i32) {
    %c0_i32 = arith.constant 0 : i32
    return %arg0, %arg1 : i32, i32
  }
}

</mosaic_0001>

<bundles_post_ra>
// kernel: coarse_mask_head_forward.6
= control target key start
LH: loop header
LB: loop body
LE: loop exit
PB: predicated region body
PF: predicated region fallthrough
CT: control target
= control target key end

     0   :  { %s477_s1 = inlined_call_operand.vmem [shape: bf16[256,128], index: 1, kind: input, shape index: {}]   ;;  %s478_s0 = inlined_call_operand.vmem [shape: bf16[32,256], index: 0, kind: input, shape index: {}]   ;;  %s479_s2 = inlined_call_operand.vmem [shape: f32[1,128], index: 2, kind: input, shape index: {}]   ;;  %s480_s3 = inlined_call_operand.vmem [shape: bf16[32,128], index: 3, kind: output, shape index: {}]  }
   0x1   :  { %v366_v0 = vld [vmem:[%s477_s1 + $0x40] sm:$0xff]   ;;  %v368_v2 = vld [vmem:[%s477_s1 + $0x48] sm:$0xff]   ;;  %v370_v4 = vld [vmem:[%s477_s1 + $0x50] sm:$0xff]  }
   0x2   :  { %v367_v1 = vld [vmem:[%s477_s1] sm:$0xff]   ;;  %322 = vmatprep.subr.bf16.mxu0 %v366_v0  ;;  %350 = vmatprep.subr.bf16.mxu1 %v366_v0  ;;  %v369_v3 = vld [vmem:[%s477_s1 + $0x8] sm:$0xff]   ;;  %v371_v5 = vld [vmem:[%s477_s1 + $0x10] sm:$0xff]  }
   0x3   :  { %323 = vmatpush3.bf16.msra.mxu0 %v367_v1  ;;  %358 = vmatpush3.bf16.msra.mxu1 %v367_v1  ;;  %v372_v6 = vld [vmem:[%s477_s1 + $0x58] sm:$0xff]   ;;  %v374_v8 = vld [vmem:[%s477_s1 + $0x60] sm:$0xff]   ;;  %v376_v10 = vld [vmem:[%s477_s1 + $0x68] sm:$0xff]  }
   0x4   :  { %324 = vmatprep.subr.bf16.mxu0 %v368_v2  ;;  %351 = vmatprep.subr.bf16.mxu1 %v368_v2  ;;  %v373_v7 = vld [vmem:[%s477_s1 + $0x18] sm:$0xff]   ;;  %v375_v9 = vld [vmem:[%s477_s1 + $0x20] sm:$0xff]   ;;  %v377_v13 = vld [vmem:[%s477_s1 + $0x28] sm:$0xff]  }
   0x5   :  { %v384_v11 = vld [vmem:[%s478_s0 + $0x4] ss:$8 sps:$4 sm:$0xff]   ;;  %v387_v12 = vld [vmem:[%s478_s0 + $0x14] ss:$8 sps:$4 sm:$0xff]   ;;  %v382_v18 = vld [vmem:[%s478_s0] ss:$8 sps:$4 sm:$0xff]  }
   0x6   :  { %v378_v14 = vld [vmem:[%s477_s1 + $0x70] sm:$0xff]   ;;  %211 = vmatprep.mubr.bf16.mxu0 %v384_v11  ;;  %219 = vmatprep.mubr.bf16.mxu1 %v387_v12  ;;  %v380_v16 = vld [vmem:[%s477_s1 + $0x78] sm:$0xff]   ;;  %v302_v23 = vld [vmem:[%s479_s2] ss:$0 sm:$0xff] }
   0x7   :  { %325 = vmatpush3.bf16.msra.mxu0 %v369_v3  ;;  %359 = vmatpush3.bf16.msra.mxu1 %v369_v3  ;;  %v379_v15 = vld [vmem:[%s477_s1 + $0x30] sm:$0xff]   ;;  %v381_v17 = vld [vmem:[%s477_s1 + $0x38] sm:$0xff]  }
   0x8   :  { %326 = vmatprep.subr.bf16.mxu0 %v370_v4  ;;  %352 = vmatprep.subr.bf16.mxu1 %v370_v4  ;;  %v385_v19 = vld [vmem:[%s478_s0 + $0x10] ss:$8 sps:$4 sm:$0xff]  }
   0xb   :  { %327 = vmatpush3.bf16.msra.mxu0 %v371_v5  ;;  %360 = vmatpush3.bf16.msra.mxu1 %v371_v5 }
   0xc   :  { %328 = vmatprep.subr.bf16.mxu0 %v372_v6  ;;  %353 = vmatprep.subr.bf16.mxu1 %v372_v6 }
   0xf   :  { %329 = vmatpush3.bf16.msra.mxu0 %v373_v7  ;;  %361 = vmatpush3.bf16.msra.mxu1 %v373_v7 }
  0x10   :  { %330 = vmatprep.subr.bf16.mxu0 %v374_v8  ;;  %354 = vmatprep.subr.bf16.mxu1 %v374_v8 }
  0x13   :  { %331 = vmatpush3.bf16.msra.mxu0 %v375_v9  ;;  %362 = vmatpush3.bf16.msra.mxu1 %v375_v9 }
  0x14   :  { %332 = vmatprep.subr.bf16.mxu0 %v376_v10  ;;  %355 = vmatprep.subr.bf16.mxu1 %v376_v10 }
  0x17   :  { %333 = vmatpush3.bf16.msra.mxu0 %v377_v13  ;;  %363 = vmatpush3.bf16.msra.mxu1 %v377_v13 }
  0x18   :  { %334 = vmatprep.subr.bf16.mxu0 %v378_v14  ;;  %356 = vmatprep.subr.bf16.mxu1 %v378_v14 }
  0x1b   :  { %335 = vmatpush3.bf16.msra.mxu0 %v379_v15  ;;  %364 = vmatpush3.bf16.msra.mxu1 %v379_v15 }
  0x1c   :  { %336 = vmatprep.subr.bf16.mxu0 %v380_v16  ;;  %357 = vmatprep.subr.bf16.mxu1 %v380_v16 }
  0x1f   :  { %337 = vmatpush3.bf16.msra.mxu0 %v381_v17  ;;  %365 = vmatpush3.bf16.msra.mxu1 %v381_v17 }
  0x22   :  { %212 = vmatmul.mubr.bf16.vlgmr.msra.gmra.mrb[0].mxu0 %v382_v18  ;;  %220 = vmatmul.mubr.bf16.vlgmr.msra.gmra.mrb[0].mxu1 %v385_v19 }
  0xf5   :  { %v338_v20 = vpop.f32.mrb[0].mxu0  ;;  %v344_v21 = vpop.f32.mrb[0].mxu1 }
  0xf6   :  { %v339_v22 = vpop.f32.mrb[1].mxu0  ;;  %v345_v24 = vpop.f32.mrb[1].mxu1 }
  0xf7   :  { %v340_v25 = vadd.f32 %v339_v22, %v338_v20  ;;  %v346_v26 = vadd.f32 %v345_v24, %v344_v21  ;;  %v341_v27 = vpop.f32.mrb[2].mxu0  ;;  %v347_v28 = vpop.f32.mrb[2].mxu1 }
  0xf8   :  { %v342_v29 = vpop.f32.mrb[3].mxu0  ;;  %v348_v30 = vpop.f32.mrb[3].mxu1 }
  0xf9   :  { %v250_v31 = vadd.f32 %v340_v25, %v302_v23  ;;  %v252_v32 = vadd.f32 %v346_v26, %v302_v23  ;;  %v343_v33 = vadd.f32 %v342_v29, %v341_v27  ;;  %v349_v34 = vadd.f32 %v348_v30, %v347_v28 }
  0xfb   :  { %v251_v35 = vadd.f32 %v343_v33, %v302_v23  ;;  %v253_v36 = vadd.f32 %v349_v34, %v302_v23  ;;  %v254_v37 = vmax.f32 %v250_v31, 0.0  ;;  %v256_v38 = vmax.f32 %v252_v32, 0.0 }
  0xfd   :  { %v255_v39 = vmax.f32 %v251_v35, 0.0  ;;  %v257_v40 = vmax.f32 %v253_v36, 0.0 }
  0xff   :  { %v314_v41 = vpack.c.bf16 %v255_v39, %v254_v37  ;;  %v319_v42 = vpack.c.bf16 %v257_v40, %v256_v38 }
 0x101   :  { %315 = vst [vmem:[%s480_s3] sm:$0xff] %v314_v41   ;;  %321 = vst [vmem:[%s480_s3 + $0x8] sm:$0xff] %v319_v42  }

// kernel: coarse_mask_head_forward.5
= control target key start
LH: loop header
LB: loop body
LE: loop exit
PB: predicated region body
PF: predicated region fallthrough
CT: control target
= control target key end

     0   :  { %8 = vsyncpa [#allocation4], 0  ;;  %s731_s0 = inlined_call_operand.hbm [shape: f32[128,128], index: 0, kind: input, shape index: {}]   ;;  %s732_s1 = inlined_call_operand.hbm [shape: bf16[128,128], index: 1, kind: input, shape index: {}]   ;;  %s733_s2 = inlined_call_operand.vmem [shape: f32[1,128], index: 2, kind: input, shape index: {}]   ;;  %s734_s3 = inlined_call_operand.vmem [shape: bf16[128,128], index: 3, kind: output, shape index: {}]  }
   0x1   :  { %9 = vsyncpa [#allocation6], 0  ;;  %s654_s12 = smov [#allocation3]   ;;  %s606_s16 = scalar_lea.hbm %s731_s0, 2048 }
   0x2   :  { %s15_s13 = sshll.u32 %s654_s12, 4  ;;  %p607_p0 = scmp.ne.s32.totalorder %s731_s0, %s606_s16  ;;  %s16_s13 = int_to_ptr.vmem [resolvable:$true] %s15_s13 }
   0x3   :  { %p610_p1 = scmp.lt.u32.totalorder %s606_s16, %s731_s0 }
   0x5   :  { %p612_p2 = pnand %p610_p1, %p607_p0 }
   0x7   :  { %615 = shalt.err (!%p612_p2)
}
   0x8   :  { %s616_s21 = scalar_lea.vmem %s16_s13, 2048  ;;  %p621_p4 = scmp.lt.s32.totalorder %s16_s13, %s16_s13 }
   0x9   :  { %p617_p3 = scmp.ne.s32.totalorder %s16_s13, %s616_s21  ;;  %p622_p5 = scmp.lt.s32.totalorder %s616_s21, %s616_s21 }
   0xb   :  { %p623_p6 = por %p622_p5, %p621_p4 }
   0xd   :  { %p624_p7 = pnand %p623_p6, %p617_p3 }
   0xf   :  { %627 = shalt.err (!%p624_p7)
}
  0x10   :  { %s655_s22 = smov 128   ;;  %s656_s23 = smov 8  }
  0x11   :  { %21 = dma.hbm_to_vmem [thread:$0]  %s731_s0, 2048, %s16_s13, [#allocation4], %s655_s22, %s655_s22, %s656_s23  }
  0x12   :  { %s657_s26 = smov [#allocation5]   ;;  %s628_s30 = scalar_lea.hbm %s732_s1, 1024 }
  0x13   :  { %s27_s27 = sshll.u32 %s657_s26, 4  ;;  %p629_p8 = scmp.ne.s32.totalorder %s732_s1, %s628_s30  ;;  %s28_s27 = int_to_ptr.vmem [resolvable:$true] %s27_s27 }
  0x14   :  { %p632_p9 = scmp.lt.u32.totalorder %s628_s30, %s732_s1 }
  0x16   :  { %p634_p10 = pnand %p632_p9, %p629_p8 }
  0x18   :  { %637 = shalt.err (!%p634_p10)
}
  0x19   :  { %s638_s8 = scalar_lea.vmem %s28_s27, 1024  ;;  %p643_p12 = scmp.lt.s32.totalorder %s28_s27, %s28_s27 }
  0x1a   :  { %p639_p11 = scmp.ne.s32.totalorder %s28_s27, %s638_s8  ;;  %p644_p13 = scmp.lt.s32.totalorder %s638_s8, %s638_s8 }
  0x1c   :  { %p645_p0 = por %p644_p13, %p643_p12 }
  0x1e   :  { %p646_p1 = pnand %p645_p0, %p639_p11 }
  0x20   :  { %649 = shalt.err (!%p646_p1)
}
  0x21   :  { %s658_s0 = smov 64   ;;  %s659_s9 = smov 4  }
  0x22   :  { %33 = dma.hbm_to_vmem [thread:$0]  %s732_s1, 1024, %s28_s27, [#allocation6], %s658_s0, %s658_s0, %s659_s9  }
  0x23   :  { %650 = dma.done.wait [#allocation4], 2048  }
  0x24   :  { %651 = vsyncadd [#allocation4], 4294965248 }
  0x25   :  { %652 = dma.done.wait [#allocation6], 1024  }
  0x26   :  { %653 = vsyncadd [#allocation6], 4294966272  ;;  %v598_v0 = vld [vmem:[#allocation5] sm:$0xff]   ;;  %v599_v1 = vld [vmem:[#allocation5 + $0x8] sm:$0xff]  }
  0x27   :  { %544 = vmatprep.subr.bf16.mxu0 %v598_v0  ;;  %576 = vmatprep.subr.bf16.mxu1 %v598_v0  ;;  %v600_v2 = vld [vmem:[#allocation5 + $0x10] sm:$0xff]   ;;  %v601_v3 = vld [vmem:[#allocation5 + $0x18] sm:$0xff]   ;;  %v79_v4 = vld [vmem:[#allocation3] sm:$0xff] }
  0x28   :  { %545 = vmatpush3.bf16.msra.mxu0 %v598_v0  ;;  %584 = vmatpush3.bf16.msra.mxu1 %v598_v0  ;;  %v80_v5 = vld [vmem:[#allocation3 + $0x8] sm:$0xff]  ;;  %v87_v6 = vld [vmem:[#allocation3 + $0x40] sm:$0xff]  ;;  %v604_v12 = vld [vmem:[#allocation5 + $0x30] sm:$0xff]  }
  0x29   :  { %546 = vmatprep.subr.bf16.mxu0 %v599_v1  ;;  %577 = vmatprep.subr.bf16.mxu1 %v599_v1  ;;  %v95_v7 = vpack.c.bf16 %v80_v5, %v79_v4  ;;  %v88_v8 = vld [vmem:[#allocation3 + $0x48] sm:$0xff]  ;;  %v602_v10 = vld [vmem:[#allocation5 + $0x20] sm:$0xff]   ;;  %v605_v13 = vld [vmem:[#allocation5 + $0x38] sm:$0xff]  }
  0x2a   :  { %v99_v9 = vpack.c.bf16 %v88_v8, %v87_v6  ;;  %v603_v11 = vld [vmem:[#allocation5 + $0x28] sm:$0xff]   ;;  %v81_v14 = vld [vmem:[#allocation3 + $0x10] sm:$0xff]  ;;  %v82_v15 = vld [vmem:[#allocation3 + $0x18] sm:$0xff] }
  0x2b   :  { %560 = vmatprep.mubr.bf16.mxu0 %v95_v7  ;;  %v89_v16 = vld [vmem:[#allocation3 + $0x50] sm:$0xff]  ;;  %v90_v17 = vld [vmem:[#allocation3 + $0x58] sm:$0xff]  ;;  %v83_v18 = vld [vmem:[#allocation3 + $0x20] sm:$0xff]  ;;  %v96_v22 = vpack.c.bf16 %v82_v15, %v81_v14 }
  0x2c   :  { %547 = vmatpush3.bf16.msra.mxu0 %v599_v1  ;;  %585 = vmatpush3.bf16.msra.mxu1 %v599_v1  ;;  %v84_v19 = vld [vmem:[#allocation3 + $0x28] sm:$0xff]  ;;  %v91_v20 = vld [vmem:[#allocation3 + $0x60] sm:$0xff]  ;;  %v100_v23 = vpack.c.bf16 %v90_v17, %v89_v16  ;;  %v85_v26 = vld [vmem:[#allocation3 + $0x30] sm:$0xff] }
  0x2d   :  { %548 = vmatprep.subr.bf16.mxu0 %v600_v2  ;;  %578 = vmatprep.subr.bf16.mxu1 %v600_v2  ;;  %v92_v21 = vld [vmem:[#allocation3 + $0x68] sm:$0xff]  ;;  %v97_v24 = vpack.c.bf16 %v84_v19, %v83_v18  ;;  %v86_v27 = vld [vmem:[#allocation3 + $0x38] sm:$0xff]  ;;  %v93_v28 = vld [vmem:[#allocation3 + $0x70] sm:$0xff] }
  0x2e   :  { %568 = vmatprep.mubr.bf16.mxu1 %v99_v9  ;;  %v101_v25 = vpack.c.bf16 %v92_v21, %v91_v20  ;;  %v94_v29 = vld [vmem:[#allocation3 + $0x78] sm:$0xff]  ;;  %v98_v30 = vpack.c.bf16 %v86_v27, %v85_v26  ;;  %v448_v32 = vld [vmem:[%s733_s2] ss:$0 sm:$0xff] }
  0x2f   :  { %v102_v31 = vpack.c.bf16 %v94_v29, %v93_v28 }
  0x30   :  { %549 = vmatpush3.bf16.msra.mxu0 %v600_v2  ;;  %586 = vmatpush3.bf16.msra.mxu1 %v600_v2 }
  0x31   :  { %550 = vmatprep.subr.bf16.mxu0 %v601_v3  ;;  %579 = vmatprep.subr.bf16.mxu1 %v601_v3 }
  0x34   :  { %551 = vmatpush3.bf16.msra.mxu0 %v601_v3  ;;  %587 = vmatpush3.bf16.msra.mxu1 %v601_v3 }
  0x35   :  { %552 = vmatprep.subr.bf16.mxu0 %v602_v10  ;;  %580 = vmatprep.subr.bf16.mxu1 %v602_v10 }
  0x38   :  { %553 = vmatpush3.bf16.msra.mxu0 %v602_v10  ;;  %588 = vmatpush3.bf16.msra.mxu1 %v602_v10 }
  0x39   :  { %554 = vmatprep.subr.bf16.mxu0 %v603_v11  ;;  %581 = vmatprep.subr.bf16.mxu1 %v603_v11 }
  0x3c   :  { %555 = vmatpush3.bf16.msra.mxu0 %v603_v11  ;;  %589 = vmatpush3.bf16.msra.mxu1 %v603_v11 }
  0x3d   :  { %556 = vmatprep.subr.bf16.mxu0 %v604_v12  ;;  %582 = vmatprep.subr.bf16.mxu1 %v604_v12 }
  0x40   :  { %557 = vmatpush3.bf16.msra.mxu0 %v604_v12  ;;  %590 = vmatpush3.bf16.msra.mxu1 %v604_v12 }
  0x41   :  { %558 = vmatprep.subr.bf16.mxu0 %v605_v13  ;;  %583 = vmatprep.subr.bf16.mxu1 %v605_v13 }
  0x44   :  { %559 = vmatpush3.bf16.msra.mxu0 %v605_v13  ;;  %591 = vmatpush3.bf16.msra.mxu1 %v605_v13 }
  0x47   :  { %561 = vmatmul.mubr.bf16.vlgmr.msra.gmra.mrb[0].mxu0 %v96_v22  ;;  %569 = vmatmul.mubr.bf16.vlgmr.msra.gmra.mrb[0].mxu1 %v100_v23 }
  0x48   :  { %564 = vmatprep.mubr.bf16.mxu0 %v97_v24  ;;  %572 = vmatprep.mubr.bf16.mxu1 %v101_v25 }
  0x4f   :  { %565 = vmatmul.mubr.bf16.gmra.mrb[4].mxu0 %v98_v30  ;;  %573 = vmatmul.mubr.bf16.gmra.mrb[4].mxu1 %v102_v31 }
 0x11a   :  { %v562_v33 = vpop.f32.mrb[0].mxu0  ;;  %v570_v34 = vpop.f32.mrb[0].mxu1 }
 0x11b   :  { %v324_v35 = vadd.f32 %v562_v33, %v448_v32  ;;  %v332_v36 = vadd.f32 %v570_v34, %v448_v32  ;;  %v201_v37 = vpop.f32.mrb[1].mxu0  ;;  %v233_v38 = vpop.f32.mrb[1].mxu1 }
 0x11c   :  { %v322_v39 = vadd.f32 %v448_v32, %v201_v37  ;;  %v330_v40 = vadd.f32 %v448_v32, %v233_v38  ;;  %v563_v41 = vpop.f32.mrb[2].mxu0  ;;  %v571_v42 = vpop.f32.mrb[2].mxu1 }
 0x11d   :  { %v325_v43 = vadd.f32 %v563_v41, %v448_v32  ;;  %v333_v44 = vadd.f32 %v571_v42, %v448_v32  ;;  %v204_v45 = vpop.f32.mrb[3].mxu0  ;;  %v236_v46 = vpop.f32.mrb[3].mxu1  ;;  %v340_v49 = vmax.f32 %v324_v35, 0.0  ;;  %v348_v50 = vmax.f32 %v332_v36, 0.0 }
 0x11e   :  { %v323_v47 = vadd.f32 %v448_v32, %v204_v45  ;;  %v331_v48 = vadd.f32 %v448_v32, %v236_v46  ;;  %v338_v53 = vmax.f32 %v322_v39, 0.0  ;;  %v346_v54 = vmax.f32 %v330_v40, 0.0 }
 0x11f   :  { %v341_v51 = vmax.f32 %v325_v43, 0.0  ;;  %v349_v52 = vmax.f32 %v333_v44, 0.0 }
 0x120   :  { %v339_v55 = vmax.f32 %v323_v47, 0.0  ;;  %v347_v56 = vmax.f32 %v331_v48, 0.0 }
 0x121   :  { %v489_v57 = vpack.c.bf16 %v341_v51, %v340_v49  ;;  %v509_v58 = vpack.c.bf16 %v349_v52, %v348_v50 }
 0x122   :  { %v484_v59 = vpack.c.bf16 %v339_v55, %v338_v53  ;;  %v504_v60 = vpack.c.bf16 %v347_v56, %v346_v54  ;;  %v566_v61 = vpop.f32.mrb[4].mxu0  ;;  %v574_v62 = vpop.f32.mrb[4].mxu1 }
 0x123   :  { %521 = vst [vmem:[%s734_s3 + $0x8] sm:$0xff] %v489_v57   ;;  %525 = vst [vmem:[%s734_s3 + $0x28] sm:$0xff] %v509_v58   ;;  %v328_v63 = vadd.f32 %v566_v61, %v448_v32  ;;  %v336_v0 = vadd.f32 %v574_v62, %v448_v32  ;;  %v217_v1 = vpop.f32.mrb[5].mxu0  ;;  %v249_v2 = vpop.f32.mrb[5].mxu1 }
 0x124   :  { %485 = vst [vmem:[%s734_s3] sm:$0xff] %v484_v59   ;;  %524 = vst [vmem:[%s734_s3 + $0x20] sm:$0xff] %v504_v60   ;;  %v326_v3 = vadd.f32 %v448_v32, %v217_v1  ;;  %v334_v4 = vadd.f32 %v448_v32, %v249_v2  ;;  %v567_v5 = vpop.f32.mrb[6].mxu0  ;;  %v575_v6 = vpop.f32.mrb[6].mxu1 }
 0x125   :  { %v329_v7 = vadd.f32 %v567_v5, %v448_v32  ;;  %v337_v8 = vadd.f32 %v575_v6, %v448_v32  ;;  %v220_v9 = vpop.f32.mrb[7].mxu0  ;;  %v252_v10 = vpop.f32.mrb[7].mxu1  ;;  %v344_v13 = vmax.f32 %v328_v63, 0.0  ;;  %v352_v14 = vmax.f32 %v336_v0, 0.0 }
 0x126   :  { %v327_v11 = vadd.f32 %v448_v32, %v220_v9  ;;  %v335_v12 = vadd.f32 %v448_v32, %v252_v10  ;;  %v342_v17 = vmax.f32 %v326_v3, 0.0  ;;  %v350_v18 = vmax.f32 %v334_v4, 0.0 }
 0x127   :  { %v345_v15 = vmax.f32 %v329_v7, 0.0  ;;  %v353_v16 = vmax.f32 %v337_v8, 0.0 }
 0x128   :  { %v343_v19 = vmax.f32 %v327_v11, 0.0  ;;  %v351_v20 = vmax.f32 %v335_v12, 0.0 }
 0x129   :  { %v499_v21 = vpack.c.bf16 %v345_v15, %v344_v13  ;;  %v519_v22 = vpack.c.bf16 %v353_v16, %v352_v14 }
 0x12a   :  { %v494_v23 = vpack.c.bf16 %v343_v19, %v342_v17  ;;  %v514_v24 = vpack.c.bf16 %v351_v20, %v350_v18 }
 0x12b   :  { %523 = vst [vmem:[%s734_s3 + $0x18] sm:$0xff] %v499_v21   ;;  %527 = vst [vmem:[%s734_s3 + $0x38] sm:$0xff] %v519_v22  }
 0x12c   :  { %522 = vst [vmem:[%s734_s3 + $0x10] sm:$0xff] %v494_v23   ;;  %526 = vst [vmem:[%s734_s3 + $0x30] sm:$0xff] %v514_v24  }
 0x12d   :  { %438 = vsyncpa [#allocation4], 1 }
 0x12e   :  { %439 = vsyncpa [#allocation6], 1 }

// kernel: coarse_mask_head_forward.8
= control target key start
LH: loop header
LB: loop body
LE: loop exit
PB: predicated region body
PF: predicated region fallthrough
CT: control target
= control target key end

     0   :  { %v195_v0 = vmov 0.0   ;;  %vm196_vm0 = vmmov 0   ;;  %s250_s1 = inlined_call_operand.vmem [shape: bf16[128,128], index: 1, kind: input, shape index: {}]   ;;  %s251_s0 = inlined_call_operand.vmem [shape: bf16[2,128], index: 0, kind: input, shape index: {}]   ;;  %s252_s2 = inlined_call_operand.vmem [shape: f32[1,128], index: 2, kind: input, shape index: {}]   ;;  %s253_s3 = inlined_call_operand.vmem [shape: bf16[2,128], index: 3, kind: output, shape index: {}]  }
   0x1   :  { %165 = vmatprep.subr.bf16.mxu0 %v195_v0  ;;  %19 = vst [vmem:[#allocation2] sm:$0x3] %v195_v0  ;;  %v187_v1 = vld [vmem:[%s250_s1] sm:$0xff]   ;;  %181 = vmatprep.mubr.msk.bf16.mxu0 %vm196_vm0, %v195_v0  ;;  %v188_v2 = vld [vmem:[%s250_s1 + $0x8] sm:$0xff]   ;;  %v189_v3 = vld [vmem:[%s250_s1 + $0x10] sm:$0xff]  }
   0x2   :  { %166 = vmatpush3.bf16.msra.mxu0 %v187_v1  ;;  %v190_v4 = vld [vmem:[%s250_s1 + $0x18] sm:$0xff]   ;;  %v191_v5 = vld [vmem:[%s250_s1 + $0x20] sm:$0xff]   ;;  %v192_v6 = vld [vmem:[%s250_s1 + $0x28] sm:$0xff]  }
   0x3   :  { %167 = vmatprep.subr.bf16.mxu0 %v195_v0  ;;  %v193_v7 = vld [vmem:[%s250_s1 + $0x30] sm:$0xff]   ;;  %v194_v8 = vld [vmem:[%s250_s1 + $0x38] sm:$0xff]   ;;  %v21_v9 = vld [vmem:[%s251_s0] sm:$0x1] }
   0x4   :  { %v155_v16 = vld [vmem:[%s252_s2] ss:$0 sm:$0xff] }
   0x6   :  { %168 = vmatpush3.bf16.msra.mxu0 %v188_v2 }
   0x7   :  { %169 = vmatprep.subr.bf16.mxu0 %v195_v0 }
   0x8   :  { %v20_v10 = vld [vmem:[#allocation2] sm:$0x3] }
   0xa   :  { %170 = vmatpush3.bf16.msra.mxu0 %v189_v3 }
   0xb   :  { %171 = vmatprep.subr.bf16.mxu0 %v195_v0 }
   0xe   :  { %172 = vmatpush3.bf16.msra.mxu0 %v190_v4 }
   0xf   :  { %173 = vmatprep.subr.bf16.mxu0 %v195_v0 }
  0x12   :  { %174 = vmatpush3.bf16.msra.mxu0 %v191_v5 }
  0x13   :  { %175 = vmatprep.subr.bf16.mxu0 %v195_v0 }
  0x16   :  { %176 = vmatpush3.bf16.msra.mxu0 %v192_v6 }
  0x17   :  { %177 = vmatprep.subr.bf16.mxu0 %v195_v0 }
  0x1a   :  { %178 = vmatpush3.bf16.msra.mxu0 %v193_v7 }
  0x1b   :  { %179 = vmatprep.subr.bf16.mxu0 %v195_v0 }
  0x1e   :  { %180 = vmatpush3.bf16.msra.mxu0 %v194_v8 }
  0x21   :  { %182 = vmatmul.mubr.bf16.vlgmr.msra.gmra.mrb[0].mxu0 %v21_v9 }
  0xf4   :  { %v120_v11 = vpop.f32.mrb[0].mxu0 }
  0xf5   :  { %v126_v12 = vadd.f32 %v120_v11, %v20_v10  ;;  %v183_v13 = vpop.f32.mrb[1].mxu0 }
  0xf6   :  { %v123_v14 = vpop.f32.mrb[2].mxu0 }
  0xf7   :  { %127 = vst [vmem:[#allocation2] sm:$0x3] %v126_v12  ;;  %v184_v15 = vpop.f32.mrb[3].mxu0 }
  0xfe   :  { %v131_v17 = vld [vmem:[#allocation2] sm:$0x3] }
  0xff   :  { %v139_v18 = vadd.f32 %v155_v16, %v131_v17 }
 0x101   :  { %v140_v19 = vmax.f32 %v139_v18, 0.0 }
 0x103   :  { %v141_v20 = vpack.c.bf16 %v140_v19, %v140_v19 }
 0x105   :  { %142 = vst [vmem:[%s253_s3] sm:$0x1] %v141_v20 }

// kernel: coarse_mask_head_forward.7
= control target key start
LH: loop header
LB: loop body
LE: loop exit
PB: predicated region body
PF: predicated region fallthrough
CT: control target
= control target key end

     0   :  { %s936_s12 = smov 0   ;;  %s938_s13 = smov 0   ;;  %s1023_s0 = inlined_call_operand.vmem [shape: bf16[2,1024], index: 0, kind: input, shape index: {}]   ;;  %s1024_s1 = inlined_call_operand.vmem [shape: bf16[1024,128], index: 1, kind: input, shape index: {}]   ;;  %s1025_s2 = inlined_call_operand.vmem [shape: f32[1,128], index: 2, kind: input, shape index: {}]   ;;  %s1026_s3 = inlined_call_operand.vmem [shape: bf16[2,128], index: 3, kind: output, shape index: {}]  }
   0x1   :  { %s940_s14 = smov 0  }
   0x2 LB: > { %s25_s15 = sadd.s32 1, %s908_s13  ;;  %p745_p0 = scmp.ge.s32.totalorder %s912_s14, 1  ;;  %s912_s14 = sphi %s940_s14, %s13_s14   ;;  %s908_s13 = sphi %s938_s13, %s1028_s13   ;;  %s904_s12 = sphi %s936_s12, %s1027_s12  }
   0x3   : > { %p26_p1 = scmp.ge.s32.totalorder %s25_s15, 2  ;;  %p188_p2 = scmp.lt.s32.totalorder %s912_s14, 3 }
   0x5   : > { %s1030_s15 = smov (%p26_p1, %s25_s15), 0  ;;  %p189_p3 = pnand %p745_p0, %p188_p2 }
   0x6   : > { %s746_s16 = sshll.u32 (!%p189_p3), %s904_s12, 2  ;;  %s747_s17 = sshll.u32 (!%p189_p3), %s904_s12, 6 }
   0x7   : > { %192 = sbr.rel (%p189_p3) target bundleno = 292 (0x124), region = 32  ;;  %p230_p4 = scmp.lt.s32.totalorder (!%p189_p3), %s746_s16, 7 }
   0x8   : > { %p237_p5 = scmp.lt.s32.totalorder (!%p189_p3), %s747_s17, 127  ;;  %p749_p6 = scmp.ne.s32.totalorder (!%p189_p3), %s904_s12, 0 }
   0xe   : > { %s1032_s16 = smov (!%p230_p4, %s746_s16), 7  ;;  %s1034_s17 = smov (!%p237_p5, %s747_s17), 127 }
   0xf   : > { %s234_s20 = scalar_lea.vmem %s1023_s0, %s1032_s16  ;;  %s748_s21 = sshll.u32 %s1034_s17, 2  ;;  %v914_v0 = vmov (!%p749_p6), 0.0  }
  0x10   : > { %s967_s24 = scalar_lea.vmem %s1024_s1, %s748_s21  ;;  %258 = sbr.rel (%p749_p6) target bundleno = 23 (0x17), region = 36  ;;  %259 = vst [vmem:[#allocation2] sm:$0x3] (!%p749_p6), %v914_v0 }
  0x17 PF: > { %v858_v1 = vld [vmem:[%s967_s24 + $0x40] sm:$0xff]   ;;  %v862_v5 = vld [vmem:[%s967_s24 + $0x48] sm:$0xff]   ;;  %v866_v9 = vld [vmem:[%s967_s24 + $0x50] sm:$0xff]   ;;  %v338_v31 = vlaneseq  ;;  %v915_v35 = vmov 1966171168   ;;  %p783_p7 = scmp.ne.s32.totalorder %s904_s12, 1 }
  0x18   : > { %v859_v2 = vld [vmem:[%s967_s24 + $0xc0] sm:$0xff]   ;;  %788 = vmatprep.subr.bf16.mxu0 %v858_v1  ;;  %v863_v6 = vld [vmem:[%s967_s24 + $0xc8] sm:$0xff]   ;;  %v867_v10 = vld [vmem:[%s967_s24 + $0xd0] sm:$0xff]   ;;  %v336_v36 = vunpack.c.l.s4 %v915_v35 }
  0x19   : > { %v860_v3 = vld [vmem:[%s967_s24] sm:$0xff]   ;;  %810 = vmatprep.subr.bf16.mxu1 %v859_v2  ;;  %v864_v7 = vld [vmem:[%s967_s24 + $0x8] sm:$0xff]   ;;  %v868_v11 = vld [vmem:[%s967_s24 + $0x10] sm:$0xff]   ;;  %v339_v37 = vshrl.u32 %v338_v31, 7 }
  0x1a   : > { %v861_v4 = vld [vmem:[%s967_s24 + $0x80] sm:$0xff]   ;;  %789 = vmatpush3.bf16.msra.mxu0 %v860_v3  ;;  %v865_v8 = vld [vmem:[%s967_s24 + $0x88] sm:$0xff]   ;;  %v869_v12 = vld [vmem:[%s967_s24 + $0x90] sm:$0xff]   ;;  %v337_v39 = vunpack.c.0.s8 %v336_v36 }
  0x1b   : > { %811 = vmatpush3.bf16.msra.mxu1 %v861_v4  ;;  %790 = vmatprep.subr.bf16.mxu0 %v862_v5  ;;  %v870_v13 = vld [vmem:[%s967_s24 + $0x58] sm:$0xff]   ;;  %v874_v17 = vld [vmem:[%s967_s24 + $0x60] sm:$0xff]   ;;  %v878_v21 = vld [vmem:[%s967_s24 + $0x68] sm:$0xff]  }
  0x1c   : > { %812 = vmatprep.subr.bf16.mxu1 %v863_v6  ;;  %v871_v14 = vld [vmem:[%s967_s24 + $0xd8] sm:$0xff]   ;;  %v875_v18 = vld [vmem:[%s967_s24 + $0xe0] sm:$0xff]   ;;  %v879_v22 = vld [vmem:[%s967_s24 + $0xe8] sm:$0xff]   ;;  %v340_v40 = vsub.s32 %v337_v39, %v339_v37 }
  0x1d   : > { %v872_v15 = vld [vmem:[%s967_s24 + $0x18] sm:$0xff]   ;;  %v876_v19 = vld [vmem:[%s967_s24 + $0x20] sm:$0xff]   ;;  %v880_v23 = vld [vmem:[%s967_s24 + $0x28] sm:$0xff]  }
  0x1e   : > { %791 = vmatpush3.bf16.msra.mxu0 %v864_v7  ;;  %v873_v16 = vld [vmem:[%s967_s24 + $0x98] sm:$0xff]   ;;  %v877_v20 = vld [vmem:[%s967_s24 + $0xa0] sm:$0xff]   ;;  %v881_v24 = vld [vmem:[%s967_s24 + $0xa8] sm:$0xff]  }
  0x1f   : > { %813 = vmatpush3.bf16.msra.mxu1 %v865_v8  ;;  %792 = vmatprep.subr.bf16.mxu0 %v866_v9  ;;  %v882_v25 = vld [vmem:[%s967_s24 + $0x70] sm:$0xff]   ;;  %v886_v29 = vld [vmem:[%s967_s24 + $0x78] sm:$0xff]   ;;  %v750_v34 = vld.sshfl [vmem:[%s234_s20] sm:$0x33 pattern:$0x75316420] }
  0x20   : > { %814 = vmatprep.subr.bf16.mxu1 %v867_v10  ;;  %v883_v26 = vld [vmem:[%s967_s24 + $0xf0] sm:$0xff]   ;;  %v887_v30 = vld [vmem:[%s967_s24 + $0xf8] sm:$0xff]   ;;  %v334_v38 = vcombine.high %v750_v34, %v750_v34  ;;  %v341_v42 = vrot.slane %v750_v34, %v340_v40  ;;  %v260_v54 = vld [vmem:[#allocation2] sm:$0x3] }
  0x21   : > { %v884_v27 = vld [vmem:[%s967_s24 + $0x30] sm:$0xff]   ;;  %v888_v32 = vld [vmem:[%s967_s24 + $0x38] sm:$0xff]   ;;  %v784_v59 = vld [vmem:[%s1025_s2] ss:$0 sm:$0xff] (!%p783_p7) }
  0x22   : > { %793 = vmatpush3.bf16.msra.mxu0 %v868_v11  ;;  %v885_v28 = vld [vmem:[%s967_s24 + $0xb0] sm:$0xff]   ;;  %v889_v33 = vld [vmem:[%s967_s24 + $0xb8] sm:$0xff]   ;;  %v348_v41 = vrot.slane %v334_v38, %v340_v40  ;;  %v349_v44 = vcombine.high %v341_v42, %v341_v42 }
  0x23   : > { %815 = vmatpush3.bf16.msra.mxu1 %v869_v12  ;;  %794 = vmatprep.subr.bf16.mxu0 %v870_v13 }
  0x24   : > { %816 = vmatprep.subr.bf16.mxu1 %v871_v14  ;;  %579 = vmatprep.mubr.bf16.mxu0 %v348_v41  ;;  %v350_v43 = vcombine.high %v348_v41, %v348_v41 }
  0x26   : > { %795 = vmatpush3.bf16.msra.mxu0 %v872_v15  ;;  %619 = vmatprep.mubr.bf16.mxu1 %v350_v43 }
  0x27   : > { %817 = vmatpush3.bf16.msra.mxu1 %v873_v16  ;;  %796 = vmatprep.subr.bf16.mxu0 %v874_v17 }
  0x28   : > { %818 = vmatprep.subr.bf16.mxu1 %v875_v18 }
  0x2a   : > { %797 = vmatpush3.bf16.msra.mxu0 %v876_v19 }
  0x2b   : > { %819 = vmatpush3.bf16.msra.mxu1 %v877_v20  ;;  %798 = vmatprep.subr.bf16.mxu0 %v878_v21 }
  0x2c   : > { %820 = vmatprep.subr.bf16.mxu1 %v879_v22 }
  0x2e   : > { %799 = vmatpush3.bf16.msra.mxu0 %v880_v23 }
  0x2f   : > { %821 = vmatpush3.bf16.msra.mxu1 %v881_v24  ;;  %800 = vmatprep.subr.bf16.mxu0 %v882_v25 }
  0x30   : > { %822 = vmatprep.subr.bf16.mxu1 %v883_v26 }
  0x32   : > { %801 = vmatpush3.bf16.msra.mxu0 %v884_v27 }
  0x33   : > { %823 = vmatpush3.bf16.msra.mxu1 %v885_v28  ;;  %802 = vmatprep.subr.bf16.mxu0 %v886_v29 }
  0x34   : > { %824 = vmatprep.subr.bf16.mxu1 %v887_v30 }
  0x36   : > { %803 = vmatpush3.bf16.msra.mxu0 %v888_v32 }
  0x37   : > { %825 = vmatpush3.bf16.msra.mxu1 %v889_v33 }
  0x39   : > { %580 = vmatmul.mubr.bf16.vlgmr.msra.gmra.mrb[0].mxu0 %v341_v42 }
  0x3a   : > { %620 = vmatmul.mubr.bf16.vlgmr.msra.gmra.mrb[0].mxu1 %v349_v44 }
 0x10c   : > { %v804_v45 = vpop.f32.mrb[0].mxu0 }
 0x10d   : > { %v805_v46 = vpop.f32.mrb[1].mxu0  ;;  %v826_v47 = vpop.f32.mrb[0].mxu1 }
 0x10e   : > { %v806_v48 = vadd.f32 %v805_v46, %v804_v45  ;;  %v807_v49 = vpop.f32.mrb[2].mxu0  ;;  %v827_v50 = vpop.f32.mrb[1].mxu1 }
 0x10f   : > { %v808_v51 = vpop.f32.mrb[3].mxu0  ;;  %v828_v52 = vadd.f32 %v827_v50, %v826_v47  ;;  %v829_v53 = vpop.f32.mrb[2].mxu1  ;;  %632 = sbr.rel (%p783_p7) target bundleno = 292 (0x124), region = 40 }
 0x110   : > { %v830_v55 = vpop.f32.mrb[3].mxu1 }
 0x111   : > { %v622_v56 = vadd.f32 %v828_v52, %v806_v48 }
 0x113   : > { %v627_v57 = vadd.f32 %v622_v56, %v260_v54 }
 0x115   : > { %628 = vst [vmem:[#allocation2] sm:$0x3] %v627_v57 }
 0x11c   : > { %v633_v58 = vld [vmem:[#allocation2] sm:$0x3] }
 0x11d   : > { %v641_v60 = vadd.f32 %v784_v59, %v633_v58 }
 0x11f   : > { %v642_v61 = vmax.f32 %v641_v60, 0.0 }
 0x121   : > { %v643_v62 = vpack.c.bf16 %v642_v61, %v642_v61 }
 0x123   : > { %644 = vst [vmem:[%s1026_s3] sm:$0x1] %v643_v62 }
 0x124 PF: > { %s13_s14 = sadd.s32 1, %s912_s14   ;;  %s1027_s12 = smov %s908_s13 }
 0x125   : > { %p10_p8 = scmp.ge.s32.totalorder %s13_s14, 4   ;;  %s1028_s13 = smov %s1030_s15 }
 0x127   :  { %12 = sbr.rel (!%p10_p8) target bundleno = 2 (0x2), region = 76 }

// kernel: coarse_mask_head_forward.9
= control target key start
LH: loop header
LB: loop body
LE: loop exit
PB: predicated region body
PF: predicated region fallthrough
CT: control target
= control target key end

     0   :  { %v244_v1 = vmov 0   ;;  %v245_v18 = vmov 0.0   ;;  %v246_v19 = vmov 1983009808   ;;  %v165_v21 = vlaneseq  ;;  %s324_s1 = inlined_call_operand.vmem [shape: bf16[128,256], index: 1, kind: input, shape index: {}]   ;;  %s325_s0 = inlined_call_operand.vmem [shape: bf16[2,128], index: 0, kind: input, shape index: {}]   ;;  %s326_s2 = inlined_call_operand.vmem [shape: f32[1,256], index: 2, kind: input, shape index: {}]   ;;  %s327_s3 = inlined_call_operand.vmem [shape: f32[2,256], index: 3, kind: output, shape index: {}]  }
   0x1   :  { %v220_v0 = vld [vmem:[%s324_s1 + $0x4] ss:$8 sps:$4 sm:$0xff]   ;;  %150 = vmatprep.mubr.bf16.mxu0 %v244_v1  ;;  %v222_v2 = vld [vmem:[%s324_s1] ss:$8 sps:$4 sm:$0xff]   ;;  %v223_v3 = vld [vmem:[%s324_s1 + $0x14] ss:$8 sps:$4 sm:$0xff]   ;;  %v163_v20 = vunpack.c.l.s4 %v246_v19 }
   0x2   :  { %118 = vmatprep.subr.bf16.mxu0 %v220_v0  ;;  %v225_v4 = vld [vmem:[%s324_s1 + $0x10] ss:$8 sps:$4 sm:$0xff]   ;;  %v226_v5 = vld [vmem:[%s324_s1 + $0x24] ss:$8 sps:$4 sm:$0xff]   ;;  %v228_v6 = vld [vmem:[%s324_s1 + $0x20] ss:$8 sps:$4 sm:$0xff]  }
   0x3   :  { %119 = vmatpush1.bf16.msra.mxu0 %v222_v2  ;;  %v229_v7 = vld [vmem:[%s324_s1 + $0x34] ss:$8 sps:$4 sm:$0xff]   ;;  %v231_v8 = vld [vmem:[%s324_s1 + $0x30] ss:$8 sps:$4 sm:$0xff]   ;;  %v232_v9 = vld [vmem:[%s324_s1 + $0x44] ss:$8 sps:$4 sm:$0xff]   ;;  %v164_v22 = vunpack.c.0.s8 %v163_v20 }
   0x4   :  { %120 = vmatprep.subr.bf16.mxu0 %v223_v3  ;;  %v234_v10 = vld [vmem:[%s324_s1 + $0x40] ss:$8 sps:$4 sm:$0xff]   ;;  %v235_v11 = vld [vmem:[%s324_s1 + $0x54] ss:$8 sps:$4 sm:$0xff]   ;;  %v237_v12 = vld [vmem:[%s324_s1 + $0x50] ss:$8 sps:$4 sm:$0xff]  }
   0x5   :  { %v238_v13 = vld [vmem:[%s324_s1 + $0x64] ss:$8 sps:$4 sm:$0xff]   ;;  %v240_v14 = vld [vmem:[%s324_s1 + $0x60] ss:$8 sps:$4 sm:$0xff]   ;;  %v241_v15 = vld [vmem:[%s324_s1 + $0x74] ss:$8 sps:$4 sm:$0xff]  }
   0x6   :  { %v243_v16 = vld [vmem:[%s324_s1 + $0x70] ss:$8 sps:$4 sm:$0xff]   ;;  %v21_v17 = vld [vmem:[%s325_s0] sm:$0x1]  ;;  %19 = vst [vmem:[#allocation2] sm:$0xf] %v245_v18 }
   0x7   :  { %121 = vmatpush1.bf16.msra.mxu0 %v225_v4  ;;  %v166_v23 = vshrl.u32 %v165_v21, 7  ;;  %v176_v29 = vld [vmem:[%s326_s2] sm:$0x3] }
   0x8   :  { %122 = vmatprep.subr.bf16.mxu0 %v226_v5 }
   0x9   :  { %v167_v25 = vsub.s32 %v164_v22, %v166_v23  ;;  %v180_v26 = vsub.s32 0, %v166_v23  ;;  %v184_v27 = vsub.s32 1, %v166_v23 }
   0xb   :  { %123 = vmatpush1.bf16.msra.mxu0 %v228_v6  ;;  %v181_v35 = vrot.slane %v176_v29, %v180_v26  ;;  %v185_v36 = vrot.slane %v176_v29, %v184_v27 }
   0xc   :  { %124 = vmatprep.subr.bf16.mxu0 %v229_v7 }
   0xd   :  { %v20_v32 = vld [vmem:[#allocation2] sm:$0xf]  ;;  %v186_v38 = vcombine.low %v181_v35, %v185_v36 }
   0xf   :  { %125 = vmatpush1.bf16.msra.mxu0 %v231_v8  ;;  %v193_v39 = vrot.slane %v186_v38, %v167_v25 }
  0x10   :  { %126 = vmatprep.subr.bf16.mxu0 %v232_v9 }
  0x13   :  { %127 = vmatpush1.bf16.msra.mxu0 %v234_v10 }
  0x14   :  { %128 = vmatprep.subr.bf16.mxu0 %v235_v11 }
  0x17   :  { %129 = vmatpush1.bf16.msra.mxu0 %v237_v12 }
  0x18   :  { %130 = vmatprep.subr.bf16.mxu0 %v238_v13 }
  0x1b   :  { %131 = vmatpush1.bf16.msra.mxu0 %v240_v14 }
  0x1c   :  { %132 = vmatprep.subr.bf16.mxu0 %v241_v15 }
  0x1f   :  { %133 = vmatpush1.bf16.msra.mxu0 %v243_v16 }
  0x22   :  { %151 = vmatmul.mubr.bf16.vlgmr.msra.gmra.mrb[0].mxu0 %v21_v17 }
  0xf5   :  { %v152_v24 = vpop.f32.mrb[0].mxu0 }
  0xf6   :  { %v154_v28 = vpop.f32.mrb[1].mxu0 }
  0xf7   :  { %v161_v30 = vcombine.low %v152_v24, %v154_v28  ;;  %v156_v31 = vpop.f32.mrb[2].mxu0 }
  0xf8   :  { %v157_v33 = vpop.f32.mrb[3].mxu0 }
  0xf9   :  { %v168_v34 = vrot.slane %v161_v30, %v167_v25 }
  0xfb   :  { %v170_v37 = vadd.f32 %v168_v34, %v20_v32 }
  0xfd   :  { %171 = vst [vmem:[#allocation2] sm:$0xf] %v170_v37 }
 0x104   :  { %v175_v40 = vld [vmem:[#allocation2] sm:$0xf] }
 0x105   :  { %v195_v41 = vadd.f32 %v193_v39, %v175_v40 }
 0x107   :  { %196 = vst [vmem:[%s327_s3] sm:$0xf] %v195_v41 }

</bundles_post_ra>
